<compile_context>
chip_gen: v7x
topology: tpu7x:2x2x1
jax: 0.10.0
libtpu: 0.0.40
codegen_flags: <defaults>
</compile_context>

<pallas_src>
import jax
import jax.numpy as jnp
from jax import lax
from jax.experimental import pallas as pl
from jax.experimental.pallas import tpu as pltpu

LANE = 128


def _round_up(x, m):
    return (x + m - 1) // m * m


def _physical_vmem_bytes():
    try:
        return int(pltpu.get_tpu_info().vmem_capacity_bytes)
    except Exception:
        return 64 * 2**20          # safe lower bound (v7x per-TC VMEM)


def _vmem_limit(nbytes):
    # 2x the actual buffer estimate, clamped to ~3/4 of physical VMEM
    # (~48 MiB on v7x, ~96 MiB on v5e/v6e) and floored at 8 MiB.
    cap = _physical_vmem_bytes() * 3 // 4
    return int(min(cap, max(8 * 2**20, 2 * nbytes)))


# ----------------------------------------------------------------------------
# Kernel 1: whole-sequence input projection  sum_i x_i @ W_i  + b  (all dirs)
# ----------------------------------------------------------------------------

def _make_input_proj_kernel(nx):
    def kernel(*refs):
        x_refs = refs[:nx]
        w_refs = refs[nx:2 * nx]
        b_ref = refs[2 * nx]
        o_ref = refs[2 * nx + 1]
        acc = b_ref[...] + jnp.dot(x_refs[0][...], w_refs[0][...],
                                   preferred_element_type=jnp.float32)
        for i in range(1, nx):
            acc = acc + jnp.dot(x_refs[i][...], w_refs[i][...],
                                preferred_element_type=jnp.float32)
        o_ref[...] = acc.astype(o_ref.dtype)
    return kernel


def input_projection(x_parts, w_parts, b, *, tile_m=256):
    """sum_i (M,K_i)bf16 @ (K_i,N)bf16 + (1,N)f32 -> (M,N)bf16, tiled (M, N)."""
    M = x_parts[0].shape[0]
    N = w_parts[0].shape[1]
    nx = len(x_parts)
    tile_m = min(tile_m, _round_up(M, 8))
    Mp = _round_up(M, tile_m)
    if Mp != M:
        x_parts = tuple(jnp.pad(xp, ((0, Mp - M), (0, 0))) for xp in x_parts)
    # Tile N only when the resident weight block would be large (v7x 64 MiB VMEM).
    tile_n = N
    if N > 4096:
        for cand in (2048, 1024, 512, 256, 128):
            if N % cand == 0:
                tile_n = cand
                break

    in_specs = ([pl.BlockSpec((tile_m, xp.shape[1]), lambda i, j: (i, 0))
                 for xp in x_parts]
                + [pl.BlockSpec((wp.shape[0], tile_n), lambda i, j: (0, j))
                   for wp in w_parts]
                + [pl.BlockSpec((1, tile_n), lambda i, j: (0, j))])
    vmem = (sum(2 * tile_m * xp.shape[1] * 2 for xp in x_parts)
            + sum(2 * wp.shape[0] * tile_n * 2 for wp in w_parts)
            + 2 * tile_n * 4 + 2 * tile_m * tile_n * 2 + 4096)
    out = pl.pallas_call(
        _make_input_proj_kernel(nx),
        out_shape=jax.ShapeDtypeStruct((Mp, N), jnp.bfloat16),
        grid=(Mp // tile_m, N // tile_n),
        in_specs=in_specs,
        out_specs=pl.BlockSpec((tile_m, tile_n), lambda i, j: (i, j)),
        compiler_params=pltpu.CompilerParams(
            dimension_semantics=("parallel", "parallel"),
            vmem_limit_bytes=_vmem_limit(vmem)),
    )(*x_parts, *w_parts, b)
    return out[:M]


# ----------------------------------------------------------------------------
# Kernel 2: masked LSTM recurrence, fwd/bwd interleaved, time-chunked grid
# ----------------------------------------------------------------------------

def _make_recurrence_kernel(nd, tc, nc, Hp):
    """Both directions are advanced inside one fori_loop body (2x ILP on
    single-TC chips).  Forward walks chunk k ascending; backward walks chunk
    nc-1-k descending, so the two gate streams come from different time blocks
    of the same xg array (two input specs)."""

    def kernel(*refs):
        len_ref = refs[0]
        xg_refs = refs[1:1 + nd]
        whh_ref = refs[1 + nd]
        seq_refs = refs[2 + nd:2 + 2 * nd]
        hfin_ref = refs[2 + 2 * nd]
        h_sc = refs[3 + 2 * nd]
        c_sc = refs[4 + 2 * nd]

        k = pl.program_id(0)

        @pl.when(k == 0)
        def _():
            h_sc[...] = jnp.zeros_like(h_sc)
            c_sc[...] = jnp.zeros_like(c_sc)

        lens = len_ref[...]                               # (B, 1) i32, tiny

        def step(s, carry):
            new_carry = []
            for d in range(nd):
                h, c = carry[2 * d], carry[2 * d + 1]
                lt = s if d == 0 else tc - 1 - s          # bwd walks steps reversed
                chunk = k if d == 0 else nc - 1 - k       # bwd walks chunks reversed
                t_abs = chunk * tc + lt
                # W_hh streamed from VMEM each matmul (no vreg pinning across loop)
                gates = (xg_refs[d][lt].astype(jnp.float32)
                         + jnp.dot(h.astype(jnp.bfloat16), whh_ref[d],
                                   preferred_element_type=jnp.float32))
                i_g = jax.nn.sigmoid(gates[:, 0 * Hp:1 * Hp])   # lane-aligned
                f_g = jax.nn.sigmoid(gates[:, 1 * Hp:2 * Hp])
                g_g = jnp.tanh(gates[:, 2 * Hp:3 * Hp])
                o_g = jax.nn.sigmoid(gates[:, 3 * Hp:4 * Hp])
                c_new = f_g * c + i_g * g_g
                h_new = o_g * jnp.tanh(c_new)
                mask = t_abs < lens                       # packed-sequence mask
                seq_refs[d][lt] = jnp.where(mask, h_new, 0.0).astype(jnp.bfloat16)
                new_carry.append(jnp.where(mask, h_new, h))
                new_carry.append(jnp.where(mask, c_new, c))
            return tuple(new_carry)

        init = []
        for d in range(nd):
            init += [h_sc[d], c_sc[d]]
        carry = lax.fori_loop(0, tc, step, tuple(init), unroll=2)
        for d in range(nd):
            h_sc[d] = carry[2 * d]
            c_sc[d] = carry[2 * d + 1]

        @pl.when(k == nc - 1)                             # both finals land here
        def _():
            for d in range(nd):
                hfin_ref[:, d * Hp:(d + 1) * Hp] = carry[2 * d]

    return kernel


def lstm_recurrence(xg, w_hh, lens, *, hidden_pad, num_dirs, time_chunk):
    t_pad, B, _ = xg.shape
    Hp, nd, tc = hidden_pad, num_dirs, time_chunk
    nc = t_pad // tc

    in_specs = [pl.BlockSpec((B, 1), lambda k: (0, 0)),
                pl.BlockSpec((tc, B, 4 * Hp), lambda k: (k, 0, 0))]
    args = [lens, xg]
    if nd == 2:
        in_specs.append(pl.BlockSpec((tc, B, 4 * Hp),
                                     lambda k: (nc - 1 - k, 0, 1)))
        args.append(xg)                                   # same array, bwd view
    in_specs.append(pl.BlockSpec((nd, Hp, 4 * Hp), lambda k: (0, 0, 0)))
    args.append(w_hh)

    seq_maps = [lambda k: (k, 0, 0)]
    if nd == 2:
        seq_maps.append(lambda k: (nc - 1 - k, 0, 0))
    out_shape = tuple(
        [jax.ShapeDtypeStruct((t_pad, B, Hp), jnp.bfloat16) for _ in range(nd)]
        + [jax.ShapeDtypeStruct((B, nd * Hp), jnp.float32)])
    out_specs = tuple([pl.BlockSpec((tc, B, Hp), m) for m in seq_maps]
                      + [pl.BlockSpec((B, nd * Hp), lambda k: (0, 0))])

    vmem = (nd * 2 * tc * B * 4 * Hp * 2        # xg chunks, bf16, double-buffered
            + 2 * nd * Hp * 4 * Hp * 2          # W_hh
            + nd * 2 * tc * B * Hp * 2          # seq chunks, bf16
            + 2 * B * nd * Hp * 4               # hfin
            + 2 * nd * B * Hp * 4               # h/c scratch
            + 4096)
    outs = pl.pallas_call(
        _make_recurrence_kernel(nd, tc, nc, Hp),
        out_shape=out_shape,
        grid=(nc,),
        in_specs=in_specs,
        out_specs=out_specs,
        scratch_shapes=[pltpu.VMEM((nd, B, Hp), jnp.float32),
                        pltpu.VMEM((nd, B, Hp), jnp.float32)],
        compiler_params=pltpu.CompilerParams(
            dimension_semantics=("arbitrary",),
            vmem_limit_bytes=_vmem_limit(vmem)),
    )(*args)
    return outs[:nd], outs[nd]


# ----------------------------------------------------------------------------
# Forward pass
# ----------------------------------------------------------------------------

def lstm_classifier_forward(params, text, text_lengths, *, max_time_chunk=64):
    """text: (B, T) int32 token ids (batch-first); text_lengths: (B,) int32."""
    nd = 2 if params["bidirectional"] else 1
    Hp = params["hidden_pad"]
    B, T = text.shape
    Bp = _round_up(B, 8)                           # sublane-aligned batch
    nc = -(-T // max_time_chunk)
    tc = _round_up(-(-T // nc), 8)                 # keep t_pad - T small
    t_pad = nc * tc

    emb = jnp.take(params["embedding"], text, axis=0).astype(jnp.bfloat16)
    x = jnp.transpose(emb, (1, 0, 2))                          # (T, B, E) bf16
    x = jnp.pad(x, ((0, t_pad - T), (0, Bp - B), (0, 0)))      # (t_pad, Bp, E)
    lens = jnp.pad(text_lengths.astype(jnp.int32), (0, Bp - B)).reshape(-1, 1)

    x_parts = (x.reshape(t_pad * Bp, x.shape[-1]),)
    hfin = None
    for lp in params["layers"]:
        xg = input_projection(x_parts, lp["w_ih_parts"], lp["b"])
        xg = xg.reshape(t_pad, Bp, nd * 4 * Hp)
        seq_parts, hfin = lstm_recurrence(xg, lp["w_hh"], lens, hidden_pad=Hp,
                                          num_dirs=nd, time_chunk=tc)
        # No concat between layers: next projection sums per-direction matmuls.
        x_parts = tuple(s.reshape(t_pad * Bp, Hp) for s in seq_parts)

    # hidden = cat(h_fwd, h_bwd); tiny fc head left to XLA (pure launch overhead
    # as a Pallas call).
    hidden = hfin[:B]
    return jnp.dot(hidden, params["fc_w"]) + params["fc_b"]


# ----------------------------------------------------------------------------
# Parameters: PyTorch-shaped raw weights + lane-aligned packed layout
# ----------------------------------------------------------------------------

def init_raw_params(key, input_dim, embedding_dim, hidden_dim, output_dim,
                    n_layers, bidirectional):
    keys = jax.random.split(key, 128)
    ki = iter(keys)
    scale = 1.0 / (hidden_dim ** 0.5)
    nd = 2 if bidirectional else 1
    raw = {"n_layers": n_layers, "bidirectional": bidirectional,
           "hidden_dim": hidden_dim}
    raw["embedding"] = 0.1 * jax.random.normal(
        next(ki), (input_dim, embedding_dim), jnp.float32)
    lstm = {}
    for layer in range(n_layers):
        in_dim = embedding_dim if layer == 0 else hidden_dim * nd
        for d in range(nd):
            w_ih = jax.random.uniform(next(ki), (in_dim, 4 * hidden_dim),
                                      jnp.float32, -scale, scale)
            w_hh = jax.random.uniform(next(ki), (hidden_dim, 4 * hidden_dim),
                                      jnp.float32, -scale, scale)
            b_ih = jax.random.uniform(next(ki), (1, 4 * hidden_dim),
                                      jnp.float32, -scale, scale)
            b_hh = jax.random.uniform(next(ki), (1, 4 * hidden_dim),
                                      jnp.float32, -scale, scale)
            lstm[(layer, d)] = {"w_ih": w_ih, "w_hh": w_hh, "b": b_ih + b_hh}
    raw["lstm"] = lstm
    raw["fc_w"] = jax.random.uniform(next(ki), (hidden_dim * nd, output_dim),
                                     jnp.float32, -scale, scale)
    raw["fc_b"] = jax.random.uniform(next(ki), (1, output_dim),
                                     jnp.float32, -scale, scale)
    return raw


def pack_params(raw):
    """Pad/stack raw weights into the lane-aligned kernel layout (Hp = 128*k).

    NOTE: for H < 128 the per-gate Hp padding inflates gate traffic / MXU work
    by 128/H; this keeps every slice lane-dense and is intended for H >= 128
    deployments (padded lanes carry zero weights so state stays exactly 0)."""
    H = raw["hidden_dim"]
    Hp = _round_up(H, LANE)
    nd = 2 if raw["bidirectional"] else 1

    def pad_gate_cols(w):                      # (R, 4H) -> (R, 4Hp)
        out = jnp.zeros((w.shape[0], 4 * Hp), w.dtype)
        for g in range(4):
            out = out.at[:, g * Hp:g * Hp + H].set(w[:, g * H:(g + 1) * H])
        return out

    def pad_dir_rows(w):                       # (nd*H, C) -> (nd*Hp, C)
        out = jnp.zeros((nd * Hp, w.shape[1]), w.dtype)
        for d in range(nd):
            out = out.at[d * Hp:d * Hp + H].set(w[d * H:(d + 1) * H])
        return out

    layers = []
    for layer in range(raw["n_layers"]):
        w_ihs, bs, w_hhs = [], [], []
        for d in range(nd):
            p = raw["lstm"][(layer, d)]
            w_ihs.append(pad_gate_cols(p["w_ih"]))
            bs.append(pad_gate_cols(p["b"]))
            w_hhs.append(jnp.pad(pad_gate_cols(p["w_hh"]), ((0, Hp - H), (0, 0))))
        w_ih_full = jnp.concatenate(w_ihs, axis=1)          # (in_dim, nd*4Hp)
        if layer == 0:
            w_ih_parts = (w_ih_full.astype(jnp.bfloat16),)
        else:
            w_ih_full = pad_dir_rows(w_ih_full)             # (nd*Hp, nd*4Hp)
            w_ih_parts = tuple(
                w_ih_full[di * Hp:(di + 1) * Hp].astype(jnp.bfloat16)
                for di in range(nd))
        layers.append({
            "w_ih_parts": w_ih_parts,
            "b": jnp.concatenate(bs, axis=1).astype(jnp.float32),
            "w_hh": jnp.stack(w_hhs).astype(jnp.bfloat16),  # (nd, Hp, 4Hp)
        })
    return {"bidirectional": raw["bidirectional"], "hidden_pad": Hp,
            "embedding": raw["embedding"], "layers": layers,
            "fc_w": pad_dir_rows(raw["fc_w"]), "fc_b": raw["fc_b"]}


# ----------------------------------------------------------------------------
# Pure-JAX reference (unpadded weights, f32 HIGHEST) for a sanity check
# ----------------------------------------------------------------------------

def _ref_lstm_direction(x_tm, w_ih, w_hh, b, lengths, reverse):
    T, B, _ = x_tm.shape
    H = w_hh.shape[0]
    hi = lax.Precision.HIGHEST

    def step(carry, t):
        h, c = carry
        gates = (jnp.dot(x_tm[t], w_ih, precision=hi)
                 + jnp.dot(h, w_hh, precision=hi) + b)
        i = jax.nn.sigmoid(gates[:, :H])
        f = jax.nn.sigmoid(gates[:, H:2 * H])
        g = jnp.tanh(gates[:, 2 * H:3 * H])
        o = jax.nn.sigmoid(gates[:, 3 * H:])
        c_new = f * c + i * g
        h_new = o * jnp.tanh(c_new)
        mask = t < lengths
        return ((jnp.where(mask, h_new, h), jnp.where(mask, c_new, c)),
                jnp.where(mask, h_new, 0.0))

    ts = jnp.arange(T - 1, -1, -1) if reverse else jnp.arange(T)
    (h_fin, _), outs = lax.scan(
        step, (jnp.zeros((B, H), jnp.float32),
               jnp.zeros((B, H), jnp.float32)), ts)
    if reverse:
        outs = outs[::-1]
    return outs, h_fin


def ref_forward(raw, text, text_lengths):
    emb = jnp.take(raw["embedding"], text, axis=0)
    x = jnp.transpose(emb, (1, 0, 2)).astype(jnp.float32)
    lens = text_lengths.astype(jnp.int32).reshape(-1, 1)
    nd = 2 if raw["bidirectional"] else 1
    layer_in, finals = x, None
    for layer in range(raw["n_layers"]):
        outs, fins = [], []
        for d in range(nd):
            p = raw["lstm"][(layer, d)]
            seq, h_fin = _ref_lstm_direction(layer_in, p["w_ih"], p["w_hh"],
                                             p["b"], lens, reverse=(d == 1))
            outs.append(seq)
            fins.append(h_fin)
        layer_in = jnp.concatenate(outs, axis=-1) if nd > 1 else outs[0]
        finals = fins
    hidden = jnp.concatenate(finals, axis=-1) if nd > 1 else finals[0]
    return (jnp.dot(hidden, raw["fc_w"], precision=lax.Precision.HIGHEST)
            + raw["fc_b"])


# ----------------------------------------------------------------------------

if __name__ == "__main__":
    INPUT_DIM, EMB_DIM, HID_DIM, OUT_DIM = 50, 16, 32, 4
    N_LAYERS, BIDIRECTIONAL = 2, True
    B, T = 2, 12

    key = jax.random.PRNGKey(0)
    pkey, tkey = jax.random.split(key)
    raw = init_raw_params(pkey, INPUT_DIM, EMB_DIM, HID_DIM, OUT_DIM,
                          N_LAYERS, BIDIRECTIONAL)
    params = pack_params(raw)

    text = jax.random.randint(tkey, (B, T), 0, INPUT_DIM, dtype=jnp.int32)
    # lengths sorted descending (pack_padded_sequence's enforce_sorted default)
    text_lengths = jnp.array([12, 7], dtype=jnp.int32)

    # small max_time_chunk so the multi-chunk (and reversed-chunk) path runs
    logits = lstm_classifier_forward(params, text, text_lengths,
                                     max_time_chunk=8)
    jax.block_until_ready(logits)
    assert logits.shape == (B, OUT_DIM)

    ref = ref_forward(raw, text, text_lengths)
    # Kernels use bf16 MXU operands and bf16 gate/sequence streams
    # (f32 accumulate / f32 state) vs an f32 HIGHEST reference.
    assert jnp.allclose(logits, ref, atol=3e-2, rtol=3e-2), (logits, ref)

    print("KERNEL_OK")
</pallas_src>

<mosaic_0001>
module attributes {stable_mosaic.version = 11 : i64} {
  func.func @kernel(%arg0: i32, %arg1: i32, %arg2: memref<128x16xbf16, #tpu.memory_space<vmem>>, %arg3: memref<16x1024xbf16, #tpu.memory_space<vmem>>, %arg4: memref<1x1024xf32, #tpu.memory_space<vmem>>, %arg5: memref<128x1024xbf16, #tpu.memory_space<vmem>>) attributes {dimension_semantics = [#tpu.dimension_semantics<parallel>, #tpu.dimension_semantics<parallel>], iteration_bounds = array<i64: 1, 1>, scalar_prefetch = 0 : i64, scratch_operands = 0 : i64, tpu.core_type = #tpu.core_type<tc>, window_params = [{transform_indices = @transform_0, window_bounds = array<i64: 128, 16>}, {transform_indices = @transform_1, window_bounds = array<i64: 16, 1024>}, {transform_indices = @transform_2, window_bounds = array<i64: 1, 1024>}, {transform_indices = @transform_3, window_bounds = array<i64: 128, 1024>}]} {
    %c0 = arith.constant 0 : index
    %c0_0 = arith.constant 0 : index
    %0 = vector.load %arg4[%c0, %c0_0] : memref<1x1024xf32, #tpu.memory_space<vmem>>, vector<1x1024xf32>
    %c0_1 = arith.constant 0 : index
    %c0_2 = arith.constant 0 : index
    %1 = vector.load %arg2[%c0_1, %c0_2] : memref<128x16xbf16, #tpu.memory_space<vmem>>, vector<128x16xbf16>
    %c0_3 = arith.constant 0 : index
    %c0_4 = arith.constant 0 : index
    %2 = vector.load %arg3[%c0_3, %c0_4] : memref<16x1024xbf16, #tpu.memory_space<vmem>>, vector<16x1024xbf16>
    %cst = arith.constant dense<0.000000e+00> : vector<128x1024xf32>
    %3 = tpu.matmul %1, %2, %cst {dimension_numbers = #tpu.dot_dimension_numbers<[1], [0], [0], [1], [0, 0, 1, 1], [], []>} : vector<128x16xbf16>, vector<16x1024xbf16>, vector<128x1024xf32> -> vector<128x1024xf32>
    %4 = vector.broadcast %0 : vector<1x1024xf32> to vector<128x1024xf32>
    %5 = arith.addf %4, %3 : vector<128x1024xf32>
    %6 = arith.truncf %5 : vector<128x1024xf32> to vector<128x1024xbf16>
    %c0_5 = arith.constant 0 : index
    %c0_6 = arith.constant 0 : index
    %7 = vector.load %arg5[%c0_5, %c0_6] : memref<128x1024xbf16, #tpu.memory_space<vmem>>, vector<128x1024xbf16>
    tpu.vector_store %arg5[%c0_5, %c0_6], %6 {strides = array<i32>} : memref<128x1024xbf16, #tpu.memory_space<vmem>>, vector<128x1024xbf16>,
    return
  }
  func.func @transform_0(%arg0: i32, %arg1: i32) -> (i32, i32) {
    %c0_i32 = arith.constant 0 : i32
    %c0_i32_0 = arith.constant 0 : i32
    return %arg0, %c0_i32 : i32, i32
  }
  func.func @transform_1(%arg0: i32, %arg1: i32) -> (i32, i32) {
    %c0_i32 = arith.constant 0 : i32
    %c0_i32_0 = arith.constant 0 : i32
    return %c0_i32, %arg1 : i32, i32
  }
  func.func @transform_2(%arg0: i32, %arg1: i32) -> (i32, i32) {
    %c0_i32 = arith.constant 0 : i32
    %c0_i32_0 = arith.constant 0 : i32
    return %c0_i32, %arg1 : i32, i32
  }
  func.func @transform_3(%arg0: i32, %arg1: i32) -> (i32, i32) {
    %c0_i32 = arith.constant 0 : i32
    return %arg0, %arg1 : i32, i32
  }
}

</mosaic_0001>

<bundles_post_ra>
// kernel: tpu_custom_call.1
= control target key start
LH: loop header
LB: loop body
LE: loop exit
PB: predicated region body
PF: predicated region fallthrough
CT: control target
= control target key end

     0   :  { %v1443_v6 = vmov 0   ;;  %vm121_vm0 = vcmask 130048   ;;  %s1758_s0 = inlined_call_operand.vmem [shape: bf16[128,16], index: 0, kind: input, shape index: {}]   ;;  %s1759_s1 = inlined_call_operand.vmem [shape: bf16[16,1024], index: 1, kind: input, shape index: {}]   ;;  %s1760_s2 = inlined_call_operand.vmem [shape: f32[1,1024], index: 2, kind: input, shape index: {}]   ;;  %s1761_s3 = inlined_call_operand.hbm [shape: bf16[128,1024], index: 3, kind: output, shape index: {}]  }
   0x1   :  { %v33_v0 = vld [vmem:[%s1759_s1] sm:$0xff]  ;;  %v34_v2 = vld [vmem:[%s1759_s1 + $0x8] sm:$0xff]  ;;  %178 = vmatprep.mubr.bf16.mxu0 %v1443_v6  ;;  %291 = vmatprep.mubr.bf16.mxu1 %v1443_v6  ;;  %v35_v10 = vld [vmem:[%s1759_s1 + $0x10] sm:$0xff] }
   0x2   :  { %v37_v1 = vld [vmem:[%s1759_s1 + $0x20] sm:$0xff]  ;;  %v38_v4 = vld [vmem:[%s1759_s1 + $0x28] sm:$0xff]  ;;  %v39_v11 = vld [vmem:[%s1759_s1 + $0x30] sm:$0xff] }
   0x3   :  { %v1240_v3 = vcombine.high %v33_v0, %v37_v1  ;;  %v1239_v5 = vcombine.low %v33_v0, %v37_v1  ;;  %v1242_v7 = vcombine.high %v34_v2, %v38_v4  ;;  %v1241_v8 = vcombine.low %v34_v2, %v38_v4  ;;  %v1411_v9 = vld [vmem:[%s1758_s0] sm:$0xff]   ;;  %v36_v13 = vld [vmem:[%s1759_s1 + $0x18] sm:$0xff]  ;;  %v1412_v18 = vld [vmem:[%s1758_s0 + $0x8] sm:$0xff]  }
   0x4   :  { %v1244_v12 = vcombine.high %v35_v10, %v39_v11  ;;  %v40_v14 = vld [vmem:[%s1759_s1 + $0x38] sm:$0xff]  ;;  %v1243_v15 = vcombine.low %v35_v10, %v39_v11 }
   0x5   :  { %146 = vmatprep.subr.bf16.mxu0 %v1240_v3  ;;  %259 = vmatprep.subr.bf16.mxu1 %v1242_v7  ;;  %v1246_v16 = vcombine.high %v36_v13, %v40_v14  ;;  %v1245_v17 = vcombine.low %v36_v13, %v40_v14 }
   0x6   :  { %147 = vmatpush1.bf16.msra.mxu0 %v1239_v5  ;;  %260 = vmatpush1.bf16.msra.mxu1 %v1241_v8 }
   0x7   :  { %372 = vmatprep.subr.bf16.mxu0 %v1244_v12  ;;  %485 = vmatprep.subr.bf16.mxu1 %v1246_v16 }
   0x9   :  { %1247 = vmatmul.mubr.msk.bf16.vlgmr.msra.gmra.mrb[0].mxu0 %vm121_vm0, %v1411_v9  ;;  %1255 = vmatmul.mubr.msk.bf16.vlgmr.msra.gmra.mrb[0].mxu1 %vm121_vm0, %v1411_v9 }
   0xa   :  { %373 = vmatpush1.bf16.msra.mxu0 %v1243_v15  ;;  %486 = vmatpush1.bf16.msra.mxu1 %v1245_v17 }
   0xb   :  { %188 = vmatprep.mubr.bf16.mxu0 %v1443_v6  ;;  %301 = vmatprep.mubr.bf16.mxu1 %v1443_v6 }
   0xc   :  { %8 = vsyncpa [#allocation3], 0  ;;  %v1413_v19 = vld [vmem:[%s1758_s0 + $0x10] sm:$0xff]   ;;  %v1414_v20 = vld [vmem:[%s1758_s0 + $0x18] sm:$0xff]   ;;  %v599_v25 = vlaneseq }
   0xd   :  { %v1415_v21 = vld [vmem:[%s1758_s0 + $0x20] sm:$0xff]   ;;  %v1416_v22 = vld [vmem:[%s1758_s0 + $0x28] sm:$0xff]   ;;  %v1417_v23 = vld [vmem:[%s1758_s0 + $0x30] sm:$0xff]  }
   0xe   :  { %v1418_v24 = vld [vmem:[%s1758_s0 + $0x38] sm:$0xff]   ;;  %v1579_v26 = vshrl.u32 %v599_v25, 7  ;;  %v1585_v28 = vld [vmem:[%s1760_s2] sm:$0xff]  ;;  %s1444_s2 = smov [#allocation2]  }
   0xf   :  { %s1220_s17 = sshll.u32 %s1444_s2, 4  ;;  %s1221_s17 = int_to_ptr.vmem [resolvable:$true] %s1220_s17 }
  0x10   :  { %v601_v27 = vsub.s32 0, %v1579_v26  ;;  %v609_v29 = vsub.s32 2, %v1579_v26  ;;  %v605_v30 = vsub.s32 1, %v1579_v26  ;;  %v613_v31 = vsub.s32 3, %v1579_v26  ;;  %s1419_s18 = scalar_lea.vmem %s1221_s17, 8192  ;;  %p1424_p1 = scmp.lt.s32.totalorder %s1221_s17, %s1221_s17 }
  0x11   :  { %1248 = vmatmul.mubr.msk.bf16.gmra.mrb[4].mxu0 %vm121_vm0, %v1412_v18  ;;  %1256 = vmatmul.mubr.msk.bf16.gmra.mrb[4].mxu1 %vm121_vm0, %v1412_v18  ;;  %p1420_p0 = scmp.ne.s32.totalorder %s1221_s17, %s1419_s18  ;;  %p1425_p2 = scmp.lt.s32.totalorder %s1419_s18, %s1419_s18 }
  0x12   :  { %198 = vmatprep.mubr.bf16.mxu0 %v1443_v6  ;;  %311 = vmatprep.mubr.bf16.mxu1 %v1443_v6  ;;  %v1591_v32 = vrot.slane %v1585_v28, %v601_v27  ;;  %v1594_v33 = vrot.slane %v1585_v28, %v609_v29  ;;  %v1597_v34 = vrot.slane %v1585_v28, %v605_v30 }
  0x13   :  { %v1600_v35 = vrot.slane %v1585_v28, %v613_v31  ;;  %p1426_p3 = por %p1425_p2, %p1424_p1 }
  0x15   :  { %p1427_p4 = pnand %p1426_p3, %p1420_p0 }
  0x19   :  { %1249 = vmatmul.mubr.msk.bf16.gmra.mrb[8].mxu0 %vm121_vm0, %v1413_v19  ;;  %1257 = vmatmul.mubr.msk.bf16.gmra.mrb[8].mxu1 %vm121_vm0, %v1413_v19 }
  0x1a   :  { %208 = vmatprep.mubr.bf16.mxu0 %v1443_v6  ;;  %321 = vmatprep.mubr.bf16.mxu1 %v1443_v6 }
  0x21   :  { %1250 = vmatmul.mubr.msk.bf16.gmra.mrb[12].mxu0 %vm121_vm0, %v1414_v20  ;;  %1258 = vmatmul.mubr.msk.bf16.gmra.mrb[12].mxu1 %vm121_vm0, %v1414_v20 }
  0x22   :  { %218 = vmatprep.mubr.bf16.mxu0 %v1443_v6  ;;  %331 = vmatprep.mubr.bf16.mxu1 %v1443_v6 }
  0x29   :  { %1251 = vmatmul.mubr.msk.bf16.gmra.mrb[16].mxu0 %vm121_vm0, %v1415_v21  ;;  %1259 = vmatmul.mubr.msk.bf16.gmra.mrb[16].mxu1 %vm121_vm0, %v1415_v21 }
  0x2a   :  { %228 = vmatprep.mubr.bf16.mxu0 %v1443_v6  ;;  %341 = vmatprep.mubr.bf16.mxu1 %v1443_v6 }
  0x31   :  { %1252 = vmatmul.mubr.msk.bf16.gmra.mrb[20].mxu0 %vm121_vm0, %v1416_v22  ;;  %1260 = vmatmul.mubr.msk.bf16.gmra.mrb[20].mxu1 %vm121_vm0, %v1416_v22 }
  0x32   :  { %238 = vmatprep.mubr.bf16.mxu0 %v1443_v6  ;;  %351 = vmatprep.mubr.bf16.mxu1 %v1443_v6 }
  0x39   :  { %1253 = vmatmul.mubr.msk.bf16.gmra.mrb[24].mxu0 %vm121_vm0, %v1417_v23  ;;  %1261 = vmatmul.mubr.msk.bf16.gmra.mrb[24].mxu1 %vm121_vm0, %v1417_v23 }
  0x3a   :  { %248 = vmatprep.mubr.bf16.mxu0 %v1443_v6  ;;  %361 = vmatprep.mubr.bf16.mxu1 %v1443_v6 }
  0x41   :  { %1254 = vmatmul.mubr.msk.bf16.gmra.mrb[28].mxu0 %vm121_vm0, %v1418_v24  ;;  %1262 = vmatmul.mubr.msk.bf16.gmra.mrb[28].mxu1 %vm121_vm0, %v1418_v24 }
  0x42   :  { %404 = vmatprep.mubr.bf16.mxu0 %v1443_v6  ;;  %517 = vmatprep.mubr.bf16.mxu1 %v1443_v6 }
  0x49   :  { %1263 = vmatmul.mubr.msk.bf16.vlgmr.msra.gmra.mrb[32].mxu0 %vm121_vm0, %v1411_v9  ;;  %1271 = vmatmul.mubr.msk.bf16.vlgmr.msra.gmra.mrb[32].mxu1 %vm121_vm0, %v1411_v9 }
  0x4a   :  { %414 = vmatprep.mubr.bf16.mxu0 %v1443_v6  ;;  %527 = vmatprep.mubr.bf16.mxu1 %v1443_v6 }
  0x51   :  { %1264 = vmatmul.mubr.msk.bf16.gmra.mrb[36].mxu0 %vm121_vm0, %v1412_v18  ;;  %1272 = vmatmul.mubr.msk.bf16.gmra.mrb[36].mxu1 %vm121_vm0, %v1412_v18 }
  0x52   :  { %424 = vmatprep.mubr.bf16.mxu0 %v1443_v6  ;;  %537 = vmatprep.mubr.bf16.mxu1 %v1443_v6 }
  0x59   :  { %1265 = vmatmul.mubr.msk.bf16.gmra.mrb[40].mxu0 %vm121_vm0, %v1413_v19  ;;  %1273 = vmatmul.mubr.msk.bf16.gmra.mrb[40].mxu1 %vm121_vm0, %v1413_v19 }
  0x5a   :  { %434 = vmatprep.mubr.bf16.mxu0 %v1443_v6  ;;  %547 = vmatprep.mubr.bf16.mxu1 %v1443_v6 }
  0x61   :  { %1266 = vmatmul.mubr.msk.bf16.gmra.mrb[44].mxu0 %vm121_vm0, %v1414_v20  ;;  %1274 = vmatmul.mubr.msk.bf16.gmra.mrb[44].mxu1 %vm121_vm0, %v1414_v20 }
  0x62   :  { %444 = vmatprep.mubr.bf16.mxu0 %v1443_v6  ;;  %557 = vmatprep.mubr.bf16.mxu1 %v1443_v6 }
  0x69   :  { %1267 = vmatmul.mubr.msk.bf16.gmra.mrb[48].mxu0 %vm121_vm0, %v1415_v21  ;;  %1275 = vmatmul.mubr.msk.bf16.gmra.mrb[48].mxu1 %vm121_vm0, %v1415_v21 }
  0x6a   :  { %454 = vmatprep.mubr.bf16.mxu0 %v1443_v6  ;;  %567 = vmatprep.mubr.bf16.mxu1 %v1443_v6 }
  0x71   :  { %1268 = vmatmul.mubr.msk.bf16.gmra.mrb[52].mxu0 %vm121_vm0, %v1416_v22  ;;  %1276 = vmatmul.mubr.msk.bf16.gmra.mrb[52].mxu1 %vm121_vm0, %v1416_v22 }
  0x72   :  { %464 = vmatprep.mubr.bf16.mxu0 %v1443_v6  ;;  %577 = vmatprep.mubr.bf16.mxu1 %v1443_v6 }
  0x79   :  { %1269 = vmatmul.mubr.msk.bf16.gmra.mrb[56].mxu0 %vm121_vm0, %v1417_v23  ;;  %1277 = vmatmul.mubr.msk.bf16.gmra.mrb[56].mxu1 %vm121_vm0, %v1417_v23 }
  0x7a   :  { %474 = vmatprep.mubr.bf16.mxu0 %v1443_v6  ;;  %587 = vmatprep.mubr.bf16.mxu1 %v1443_v6 }
  0x81   :  { %1270 = vmatmul.mubr.msk.bf16.gmra.mrb[60].mxu0 %vm121_vm0, %v1418_v24  ;;  %1278 = vmatmul.mubr.msk.bf16.gmra.mrb[60].mxu1 %vm121_vm0, %v1418_v24 }
  0xdc   :  { %v180_v36 = vpop.f32.mrb[0].mxu0  ;;  %v293_v38 = vpop.f32.mrb[0].mxu1 }
  0xdd   :  { %v639_v37 = vadd.f32 %v1591_v32, %v180_v36  ;;  %v182_v39 = vpop.f32.mrb[1].mxu0  ;;  %v641_v40 = vadd.f32 %v1594_v33, %v293_v38  ;;  %v295_v42 = vpop.f32.mrb[1].mxu1 }
  0xde   :  { %v640_v41 = vadd.f32 %v1597_v34, %v182_v39  ;;  %v184_v43 = vpop.f32.mrb[2].mxu0  ;;  %v642_v44 = vadd.f32 %v1600_v35, %v295_v42  ;;  %v297_v46 = vpop.f32.mrb[2].mxu1 }
  0xdf   :  { %v647_v45 = vadd.f32 %v1591_v32, %v184_v43  ;;  %v186_v47 = vpop.f32.mrb[3].mxu0  ;;  %v649_v49 = vadd.f32 %v1594_v33, %v297_v46  ;;  %v299_v51 = vpop.f32.mrb[3].mxu1 }
  0xe0   :  { %v1343_v48 = vpack.c.bf16 %v640_v41, %v639_v37  ;;  %v648_v50 = vadd.f32 %v1597_v34, %v186_v47  ;;  %v1344_v52 = vpack.c.bf16 %v642_v44, %v641_v40  ;;  %v650_v53 = vadd.f32 %v1600_v35, %v299_v51 }
  0xe2   :  { %1151 = vst [vmem:[#allocation2] sm:$0xff] %v1343_v48  ;;  %v1347_v54 = vpack.c.bf16 %v648_v50, %v647_v45  ;;  %1152 = vst [vmem:[#allocation2 + $0x8] sm:$0xff] %v1344_v52  ;;  %v1348_v55 = vpack.c.bf16 %v650_v53, %v649_v49 }
  0xe4   :  { %1155 = vst [vmem:[#allocation2 + $0x20] sm:$0xff] %v1347_v54  ;;  %v190_v56 = vpop.f32.mrb[4].mxu0  ;;  %1156 = vst [vmem:[#allocation2 + $0x28] sm:$0xff] %v1348_v55  ;;  %v303_v58 = vpop.f32.mrb[4].mxu1 }
  0xe5   :  { %v655_v57 = vadd.f32 %v1591_v32, %v190_v56  ;;  %v192_v59 = vpop.f32.mrb[5].mxu0  ;;  %v657_v60 = vadd.f32 %v1594_v33, %v303_v58  ;;  %v305_v62 = vpop.f32.mrb[5].mxu1 }
  0xe6   :  { %v656_v61 = vadd.f32 %v1597_v34, %v192_v59  ;;  %v194_v63 = vpop.f32.mrb[6].mxu0  ;;  %v658_v0 = vadd.f32 %v1600_v35, %v305_v62  ;;  %v307_v2 = vpop.f32.mrb[6].mxu1 }
  0xe7   :  { %v663_v1 = vadd.f32 %v1591_v32, %v194_v63  ;;  %v196_v3 = vpop.f32.mrb[7].mxu0  ;;  %v665_v5 = vadd.f32 %v1594_v33, %v307_v2  ;;  %v309_v7 = vpop.f32.mrb[7].mxu1 }
  0xe8   :  { %v1351_v4 = vpack.c.bf16 %v656_v61, %v655_v57  ;;  %v664_v6 = vadd.f32 %v1597_v34, %v196_v3  ;;  %v1352_v8 = vpack.c.bf16 %v658_v0, %v657_v60  ;;  %v666_v9 = vadd.f32 %v1600_v35, %v309_v7 }
  0xea   :  { %1159 = vst [vmem:[#allocation2 + $0x40] sm:$0xff] %v1351_v4  ;;  %v1355_v10 = vpack.c.bf16 %v664_v6, %v663_v1  ;;  %1160 = vst [vmem:[#allocation2 + $0x48] sm:$0xff] %v1352_v8  ;;  %v1356_v11 = vpack.c.bf16 %v666_v9, %v665_v5 }
  0xec   :  { %1163 = vst [vmem:[#allocation2 + $0x60] sm:$0xff] %v1355_v10  ;;  %v200_v12 = vpop.f32.mrb[8].mxu0  ;;  %1164 = vst [vmem:[#allocation2 + $0x68] sm:$0xff] %v1356_v11  ;;  %v313_v14 = vpop.f32.mrb[8].mxu1 }
  0xed   :  { %v671_v13 = vadd.f32 %v1591_v32, %v200_v12  ;;  %v202_v15 = vpop.f32.mrb[9].mxu0  ;;  %v673_v16 = vadd.f32 %v1594_v33, %v313_v14  ;;  %v315_v18 = vpop.f32.mrb[9].mxu1 }
  0xee   :  { %v672_v17 = vadd.f32 %v1597_v34, %v202_v15  ;;  %v204_v19 = vpop.f32.mrb[10].mxu0  ;;  %v674_v20 = vadd.f32 %v1600_v35, %v315_v18  ;;  %v317_v22 = vpop.f32.mrb[10].mxu1 }
  0xef   :  { %v679_v21 = vadd.f32 %v1591_v32, %v204_v19  ;;  %v206_v23 = vpop.f32.mrb[11].mxu0  ;;  %v681_v25 = vadd.f32 %v1594_v33, %v317_v22  ;;  %v319_v29 = vpop.f32.mrb[11].mxu1 }
  0xf0   :  { %v1359_v24 = vpack.c.bf16 %v672_v17, %v671_v13  ;;  %v680_v27 = vadd.f32 %v1597_v34, %v206_v23  ;;  %v1360_v30 = vpack.c.bf16 %v674_v20, %v673_v16  ;;  %v682_v31 = vadd.f32 %v1600_v35, %v319_v29 }
  0xf2   :  { %1167 = vst [vmem:[#allocation2 + $0x80] sm:$0xff] %v1359_v24  ;;  %v1363_v36 = vpack.c.bf16 %v680_v27, %v679_v21  ;;  %1168 = vst [vmem:[#allocation2 + $0x88] sm:$0xff] %v1360_v30  ;;  %v1364_v37 = vpack.c.bf16 %v682_v31, %v681_v25 }
  0xf4   :  { %1171 = vst [vmem:[#allocation2 + $0xa0] sm:$0xff] %v1363_v36  ;;  %v210_v38 = vpop.f32.mrb[12].mxu0  ;;  %1172 = vst [vmem:[#allocation2 + $0xa8] sm:$0xff] %v1364_v37  ;;  %v323_v40 = vpop.f32.mrb[12].mxu1 }
  0xf5   :  { %v687_v39 = vadd.f32 %v1591_v32, %v210_v38  ;;  %v212_v41 = vpop.f32.mrb[13].mxu0  ;;  %v689_v42 = vadd.f32 %v1594_v33, %v323_v40  ;;  %v325_v44 = vpop.f32.mrb[13].mxu1 }
  0xf6   :  { %v688_v43 = vadd.f32 %v1597_v34, %v212_v41  ;;  %v214_v45 = vpop.f32.mrb[14].mxu0  ;;  %v690_v46 = vadd.f32 %v1600_v35, %v325_v44  ;;  %v327_v48 = vpop.f32.mrb[14].mxu1 }
  0xf7   :  { %v695_v47 = vadd.f32 %v1591_v32, %v214_v45  ;;  %v216_v49 = vpop.f32.mrb[15].mxu0  ;;  %v697_v51 = vadd.f32 %v1594_v33, %v327_v48  ;;  %v329_v53 = vpop.f32.mrb[15].mxu1 }
  0xf8   :  { %v1367_v50 = vpack.c.bf16 %v688_v43, %v687_v39  ;;  %v696_v52 = vadd.f32 %v1597_v34, %v216_v49  ;;  %v1368_v54 = vpack.c.bf16 %v690_v46, %v689_v42  ;;  %v698_v55 = vadd.f32 %v1600_v35, %v329_v53 }
  0xfa   :  { %1175 = vst [vmem:[#allocation2 + $0xc0] sm:$0xff] %v1367_v50  ;;  %v1371_v56 = vpack.c.bf16 %v696_v52, %v695_v47  ;;  %1176 = vst [vmem:[#allocation2 + $0xc8] sm:$0xff] %v1368_v54  ;;  %v1372_v57 = vpack.c.bf16 %v698_v55, %v697_v51 }
  0xfc   :  { %1179 = vst [vmem:[#allocation2 + $0xe0] sm:$0xff] %v1371_v56  ;;  %v220_v58 = vpop.f32.mrb[16].mxu0  ;;  %1180 = vst [vmem:[#allocation2 + $0xe8] sm:$0xff] %v1372_v57  ;;  %v333_v60 = vpop.f32.mrb[16].mxu1 }
  0xfd   :  { %v703_v59 = vadd.f32 %v1591_v32, %v220_v58  ;;  %v222_v61 = vpop.f32.mrb[17].mxu0  ;;  %v705_v62 = vadd.f32 %v1594_v33, %v333_v60  ;;  %v335_v0 = vpop.f32.mrb[17].mxu1 }
  0xfe   :  { %v704_v63 = vadd.f32 %v1597_v34, %v222_v61  ;;  %v224_v1 = vpop.f32.mrb[18].mxu0  ;;  %v706_v2 = vadd.f32 %v1600_v35, %v335_v0  ;;  %v337_v4 = vpop.f32.mrb[18].mxu1  ;;  %v617_v0 = vsub.s32 4, %v1579_v26 }
  0xff   :  { %v711_v3 = vadd.f32 %v1591_v32, %v224_v1  ;;  %v226_v5 = vpop.f32.mrb[19].mxu0  ;;  %v713_v7 = vadd.f32 %v1594_v33, %v337_v4  ;;  %v339_v9 = vpop.f32.mrb[19].mxu1 }
 0x100   :  { %v1375_v6 = vpack.c.bf16 %v704_v63, %v703_v59  ;;  %v712_v8 = vadd.f32 %v1597_v34, %v226_v5  ;;  %v1376_v10 = vpack.c.bf16 %v706_v2, %v705_v62  ;;  %v714_v11 = vadd.f32 %v1600_v35, %v339_v9 }
 0x101   :  { %v625_v5 = vsub.s32 6, %v1579_v26 }
 0x102   :  { %1183 = vst [vmem:[#allocation2 + $0x100] sm:$0xff] %v1375_v6  ;;  %v1379_v12 = vpack.c.bf16 %v712_v8, %v711_v3  ;;  %1184 = vst [vmem:[#allocation2 + $0x108] sm:$0xff] %v1376_v10  ;;  %v1380_v13 = vpack.c.bf16 %v714_v11, %v713_v7  ;;  %v621_v6 = vsub.s32 5, %v1579_v26  ;;  %v629_v11 = vsub.s32 7, %v1579_v26 }
 0x104   :  { %1187 = vst [vmem:[#allocation2 + $0x120] sm:$0xff] %v1379_v12  ;;  %v230_v14 = vpop.f32.mrb[20].mxu0  ;;  %1188 = vst [vmem:[#allocation2 + $0x128] sm:$0xff] %v1380_v13  ;;  %v343_v16 = vpop.f32.mrb[20].mxu1 }
 0x105   :  { %v719_v15 = vadd.f32 %v1591_v32, %v230_v14  ;;  %v232_v17 = vpop.f32.mrb[21].mxu0  ;;  %v721_v18 = vadd.f32 %v1594_v33, %v343_v16  ;;  %v345_v20 = vpop.f32.mrb[21].mxu1 }
 0x106   :  { %v720_v19 = vadd.f32 %v1597_v34, %v232_v17  ;;  %v234_v21 = vpop.f32.mrb[22].mxu0  ;;  %v722_v22 = vadd.f32 %v1600_v35, %v345_v20  ;;  %v347_v24 = vpop.f32.mrb[22].mxu1  ;;  %v1677_v20 = vrot.slane %v1585_v28, %v621_v6 }
 0x107   :  { %v727_v23 = vadd.f32 %v1591_v32, %v234_v21  ;;  %v236_v25 = vpop.f32.mrb[23].mxu0  ;;  %v729_v29 = vadd.f32 %v1594_v33, %v347_v24  ;;  %v349_v31 = vpop.f32.mrb[23].mxu1 }
 0x108   :  { %v1383_v27 = vpack.c.bf16 %v720_v19, %v719_v15  ;;  %v728_v30 = vadd.f32 %v1597_v34, %v236_v25  ;;  %v1384_v36 = vpack.c.bf16 %v722_v22, %v721_v18  ;;  %v730_v37 = vadd.f32 %v1600_v35, %v349_v31 }
 0x109   :  { %v1671_v18 = vrot.slane %v1585_v28, %v617_v0 }
 0x10a   :  { %1191 = vst [vmem:[#allocation2 + $0x140] sm:$0xff] %v1383_v27  ;;  %v1387_v38 = vpack.c.bf16 %v728_v30, %v727_v23  ;;  %1192 = vst [vmem:[#allocation2 + $0x148] sm:$0xff] %v1384_v36  ;;  %v1388_v39 = vpack.c.bf16 %v730_v37, %v729_v29 }
 0x10c   :  { %1195 = vst [vmem:[#allocation2 + $0x160] sm:$0xff] %v1387_v38  ;;  %v240_v40 = vpop.f32.mrb[24].mxu0  ;;  %1196 = vst [vmem:[#allocation2 + $0x168] sm:$0xff] %v1388_v39  ;;  %v353_v42 = vpop.f32.mrb[24].mxu1 }
 0x10d   :  { %v735_v41 = vadd.f32 %v1591_v32, %v240_v40  ;;  %v242_v43 = vpop.f32.mrb[25].mxu0  ;;  %v737_v44 = vadd.f32 %v1594_v33, %v353_v42  ;;  %v355_v46 = vpop.f32.mrb[25].mxu1 }
 0x10e   :  { %v736_v45 = vadd.f32 %v1597_v34, %v242_v43  ;;  %v244_v47 = vpop.f32.mrb[26].mxu0  ;;  %v738_v48 = vadd.f32 %v1600_v35, %v355_v46  ;;  %v357_v50 = vpop.f32.mrb[26].mxu1 }
 0x10f   :  { %v743_v49 = vadd.f32 %v1591_v32, %v244_v47  ;;  %v246_v51 = vpop.f32.mrb[27].mxu0  ;;  %v745_v53 = vadd.f32 %v1594_v33, %v357_v50  ;;  %v359_v55 = vpop.f32.mrb[27].mxu1 }
 0x110   :  { %v1391_v52 = vpack.c.bf16 %v736_v45, %v735_v41  ;;  %v744_v54 = vadd.f32 %v1597_v34, %v246_v51  ;;  %v1392_v56 = vpack.c.bf16 %v738_v48, %v737_v44  ;;  %v746_v57 = vadd.f32 %v1600_v35, %v359_v55 }
 0x112   :  { %1199 = vst [vmem:[#allocation2 + $0x180] sm:$0xff] %v1391_v52  ;;  %v1395_v58 = vpack.c.bf16 %v744_v54, %v743_v49  ;;  %1200 = vst [vmem:[#allocation2 + $0x188] sm:$0xff] %v1392_v56  ;;  %v1396_v59 = vpack.c.bf16 %v746_v57, %v745_v53 }
 0x114   :  { %1203 = vst [vmem:[#allocation2 + $0x1a0] sm:$0xff] %v1395_v58  ;;  %v250_v60 = vpop.f32.mrb[28].mxu0  ;;  %1204 = vst [vmem:[#allocation2 + $0x1a8] sm:$0xff] %v1396_v59  ;;  %v363_v62 = vpop.f32.mrb[28].mxu1 }
 0x115   :  { %v751_v61 = vadd.f32 %v1591_v32, %v250_v60  ;;  %v252_v63 = vpop.f32.mrb[29].mxu0  ;;  %v753_v1 = vadd.f32 %v1594_v33, %v363_v62  ;;  %v365_v3 = vpop.f32.mrb[29].mxu1 }
 0x116   :  { %v752_v2 = vadd.f32 %v1597_v34, %v252_v63  ;;  %v254_v4 = vpop.f32.mrb[30].mxu0  ;;  %v754_v7 = vadd.f32 %v1600_v35, %v365_v3  ;;  %v367_v9 = vpop.f32.mrb[30].mxu1 }
 0x117   :  { %v759_v8 = vadd.f32 %v1591_v32, %v254_v4  ;;  %v256_v10 = vpop.f32.mrb[31].mxu0  ;;  %v761_v13 = vadd.f32 %v1594_v33, %v367_v9  ;;  %v369_v15 = vpop.f32.mrb[31].mxu1  ;;  %v1674_v32 = vrot.slane %v1585_v28, %v625_v5  ;;  %v1680_v33 = vrot.slane %v1585_v28, %v629_v11 }
 0x118   :  { %v1399_v12 = vpack.c.bf16 %v752_v2, %v751_v61  ;;  %v760_v14 = vadd.f32 %v1597_v34, %v256_v10  ;;  %v1400_v16 = vpack.c.bf16 %v754_v7, %v753_v1  ;;  %v762_v17 = vadd.f32 %v1600_v35, %v369_v15 }
 0x11a   :  { %1207 = vst [vmem:[#allocation2 + $0x1c0] sm:$0xff] %v1399_v12  ;;  %v1403_v19 = vpack.c.bf16 %v760_v14, %v759_v8  ;;  %1208 = vst [vmem:[#allocation2 + $0x1c8] sm:$0xff] %v1400_v16  ;;  %v1404_v26 = vpack.c.bf16 %v762_v17, %v761_v13 }
 0x11c   :  { %1211 = vst [vmem:[#allocation2 + $0x1e0] sm:$0xff] %v1403_v19  ;;  %v406_v34 = vpop.f32.mrb[32].mxu0  ;;  %1212 = vst [vmem:[#allocation2 + $0x1e8] sm:$0xff] %v1404_v26  ;;  %v519_v21 = vpop.f32.mrb[32].mxu1 }
 0x11d   :  { %v643_v35 = vadd.f32 %v1671_v18, %v406_v34  ;;  %v408_v22 = vpop.f32.mrb[33].mxu0  ;;  %v645_v23 = vadd.f32 %v1674_v32, %v519_v21  ;;  %v521_v25 = vpop.f32.mrb[33].mxu1 }
 0x11e   :  { %v644_v24 = vadd.f32 %v1677_v20, %v408_v22  ;;  %v410_v27 = vpop.f32.mrb[34].mxu0  ;;  %v646_v29 = vadd.f32 %v1680_v33, %v521_v25  ;;  %v523_v31 = vpop.f32.mrb[34].mxu1 }
 0x11f   :  { %v651_v30 = vadd.f32 %v1671_v18, %v410_v27  ;;  %v412_v28 = vpop.f32.mrb[35].mxu0  ;;  %v653_v37 = vadd.f32 %v1674_v32, %v523_v31  ;;  %v525_v39 = vpop.f32.mrb[35].mxu1 }
 0x120   :  { %v1345_v36 = vpack.c.bf16 %v644_v24, %v643_v35  ;;  %v652_v38 = vadd.f32 %v1677_v20, %v412_v28  ;;  %v1346_v40 = vpack.c.bf16 %v646_v29, %v645_v23  ;;  %v654_v41 = vadd.f32 %v1680_v33, %v525_v39 }
 0x122   :  { %1153 = vst [vmem:[#allocation2 + $0x10] sm:$0xff] %v1345_v36  ;;  %v1349_v42 = vpack.c.bf16 %v652_v38, %v651_v30  ;;  %1154 = vst [vmem:[#allocation2 + $0x18] sm:$0xff] %v1346_v40  ;;  %v1350_v43 = vpack.c.bf16 %v654_v41, %v653_v37 }
 0x124   :  { %1157 = vst [vmem:[#allocation2 + $0x30] sm:$0xff] %v1349_v42  ;;  %v416_v44 = vpop.f32.mrb[36].mxu0  ;;  %1158 = vst [vmem:[#allocation2 + $0x38] sm:$0xff] %v1350_v43  ;;  %v529_v46 = vpop.f32.mrb[36].mxu1 }
 0x125   :  { %v659_v45 = vadd.f32 %v1671_v18, %v416_v44  ;;  %v418_v47 = vpop.f32.mrb[37].mxu0  ;;  %v661_v48 = vadd.f32 %v1674_v32, %v529_v46  ;;  %v531_v50 = vpop.f32.mrb[37].mxu1 }
 0x126   :  { %v660_v49 = vadd.f32 %v1677_v20, %v418_v47  ;;  %v420_v51 = vpop.f32.mrb[38].mxu0  ;;  %v662_v52 = vadd.f32 %v1680_v33, %v531_v50  ;;  %v533_v54 = vpop.f32.mrb[38].mxu1 }
 0x127   :  { %v667_v53 = vadd.f32 %v1671_v18, %v420_v51  ;;  %v422_v55 = vpop.f32.mrb[39].mxu0  ;;  %v669_v57 = vadd.f32 %v1674_v32, %v533_v54  ;;  %v535_v59 = vpop.f32.mrb[39].mxu1 }
 0x128   :  { %v1353_v56 = vpack.c.bf16 %v660_v49, %v659_v45  ;;  %v668_v58 = vadd.f32 %v1677_v20, %v422_v55  ;;  %v1354_v60 = vpack.c.bf16 %v662_v52, %v661_v48  ;;  %v670_v61 = vadd.f32 %v1680_v33, %v535_v59 }
 0x12a   :  { %1161 = vst [vmem:[#allocation2 + $0x50] sm:$0xff] %v1353_v56  ;;  %v1357_v62 = vpack.c.bf16 %v668_v58, %v667_v53  ;;  %1162 = vst [vmem:[#allocation2 + $0x58] sm:$0xff] %v1354_v60  ;;  %v1358_v63 = vpack.c.bf16 %v670_v61, %v669_v57 }
 0x12c   :  { %1165 = vst [vmem:[#allocation2 + $0x70] sm:$0xff] %v1357_v62  ;;  %v426_v0 = vpop.f32.mrb[40].mxu0  ;;  %1166 = vst [vmem:[#allocation2 + $0x78] sm:$0xff] %v1358_v63  ;;  %v539_v2 = vpop.f32.mrb[40].mxu1 }
 0x12d   :  { %v675_v1 = vadd.f32 %v1671_v18, %v426_v0  ;;  %v428_v3 = vpop.f32.mrb[41].mxu0  ;;  %v677_v4 = vadd.f32 %v1674_v32, %v539_v2  ;;  %v541_v6 = vpop.f32.mrb[41].mxu1 }
 0x12e   :  { %v676_v5 = vadd.f32 %v1677_v20, %v428_v3  ;;  %v430_v7 = vpop.f32.mrb[42].mxu0  ;;  %v678_v8 = vadd.f32 %v1680_v33, %v541_v6  ;;  %v543_v10 = vpop.f32.mrb[42].mxu1 }
 0x12f   :  { %v683_v9 = vadd.f32 %v1671_v18, %v430_v7  ;;  %v432_v11 = vpop.f32.mrb[43].mxu0  ;;  %v685_v13 = vadd.f32 %v1674_v32, %v543_v10  ;;  %v545_v15 = vpop.f32.mrb[43].mxu1 }
 0x130   :  { %v1361_v12 = vpack.c.bf16 %v676_v5, %v675_v1  ;;  %v684_v14 = vadd.f32 %v1677_v20, %v432_v11  ;;  %v1362_v16 = vpack.c.bf16 %v678_v8, %v677_v4  ;;  %v686_v17 = vadd.f32 %v1680_v33, %v545_v15 }
 0x132   :  { %1169 = vst [vmem:[#allocation2 + $0x90] sm:$0xff] %v1361_v12  ;;  %v1365_v19 = vpack.c.bf16 %v684_v14, %v683_v9  ;;  %1170 = vst [vmem:[#allocation2 + $0x98] sm:$0xff] %v1362_v16  ;;  %v1366_v26 = vpack.c.bf16 %v686_v17, %v685_v13 }
 0x134   :  { %1173 = vst [vmem:[#allocation2 + $0xb0] sm:$0xff] %v1365_v19  ;;  %v436_v34 = vpop.f32.mrb[44].mxu0  ;;  %1174 = vst [vmem:[#allocation2 + $0xb8] sm:$0xff] %v1366_v26  ;;  %v549_v21 = vpop.f32.mrb[44].mxu1 }
 0x135   :  { %v691_v35 = vadd.f32 %v1671_v18, %v436_v34  ;;  %v438_v22 = vpop.f32.mrb[45].mxu0  ;;  %v693_v23 = vadd.f32 %v1674_v32, %v549_v21  ;;  %v551_v25 = vpop.f32.mrb[45].mxu1 }
 0x136   :  { %v692_v24 = vadd.f32 %v1677_v20, %v438_v22  ;;  %v440_v27 = vpop.f32.mrb[46].mxu0  ;;  %v694_v29 = vadd.f32 %v1680_v33, %v551_v25  ;;  %v553_v31 = vpop.f32.mrb[46].mxu1 }
 0x137   :  { %v699_v30 = vadd.f32 %v1671_v18, %v440_v27  ;;  %v442_v28 = vpop.f32.mrb[47].mxu0  ;;  %v701_v37 = vadd.f32 %v1674_v32, %v553_v31  ;;  %v555_v39 = vpop.f32.mrb[47].mxu1 }
 0x138   :  { %v1369_v36 = vpack.c.bf16 %v692_v24, %v691_v35  ;;  %v700_v38 = vadd.f32 %v1677_v20, %v442_v28  ;;  %v1370_v40 = vpack.c.bf16 %v694_v29, %v693_v23  ;;  %v702_v41 = vadd.f32 %v1680_v33, %v555_v39 }
 0x13a   :  { %1177 = vst [vmem:[#allocation2 + $0xd0] sm:$0xff] %v1369_v36  ;;  %v1373_v42 = vpack.c.bf16 %v700_v38, %v699_v30  ;;  %1178 = vst [vmem:[#allocation2 + $0xd8] sm:$0xff] %v1370_v40  ;;  %v1374_v43 = vpack.c.bf16 %v702_v41, %v701_v37 }
 0x13c   :  { %1181 = vst [vmem:[#allocation2 + $0xf0] sm:$0xff] %v1373_v42  ;;  %v446_v44 = vpop.f32.mrb[48].mxu0  ;;  %1182 = vst [vmem:[#allocation2 + $0xf8] sm:$0xff] %v1374_v43  ;;  %v559_v46 = vpop.f32.mrb[48].mxu1 }
 0x13d   :  { %v707_v45 = vadd.f32 %v1671_v18, %v446_v44  ;;  %v448_v47 = vpop.f32.mrb[49].mxu0  ;;  %v709_v48 = vadd.f32 %v1674_v32, %v559_v46  ;;  %v561_v50 = vpop.f32.mrb[49].mxu1 }
 0x13e   :  { %v708_v49 = vadd.f32 %v1677_v20, %v448_v47  ;;  %v450_v51 = vpop.f32.mrb[50].mxu0  ;;  %v710_v52 = vadd.f32 %v1680_v33, %v561_v50  ;;  %v563_v54 = vpop.f32.mrb[50].mxu1 }
 0x13f   :  { %v715_v53 = vadd.f32 %v1671_v18, %v450_v51  ;;  %v452_v55 = vpop.f32.mrb[51].mxu0  ;;  %v717_v57 = vadd.f32 %v1674_v32, %v563_v54  ;;  %v565_v59 = vpop.f32.mrb[51].mxu1 }
 0x140   :  { %v1377_v56 = vpack.c.bf16 %v708_v49, %v707_v45  ;;  %v716_v58 = vadd.f32 %v1677_v20, %v452_v55  ;;  %v1378_v60 = vpack.c.bf16 %v710_v52, %v709_v48  ;;  %v718_v61 = vadd.f32 %v1680_v33, %v565_v59 }
 0x142   :  { %1185 = vst [vmem:[#allocation2 + $0x110] sm:$0xff] %v1377_v56  ;;  %v1381_v62 = vpack.c.bf16 %v716_v58, %v715_v53  ;;  %1186 = vst [vmem:[#allocation2 + $0x118] sm:$0xff] %v1378_v60  ;;  %v1382_v63 = vpack.c.bf16 %v718_v61, %v717_v57 }
 0x144   :  { %1189 = vst [vmem:[#allocation2 + $0x130] sm:$0xff] %v1381_v62  ;;  %v456_v0 = vpop.f32.mrb[52].mxu0  ;;  %1190 = vst [vmem:[#allocation2 + $0x138] sm:$0xff] %v1382_v63  ;;  %v569_v2 = vpop.f32.mrb[52].mxu1 }
 0x145   :  { %v723_v1 = vadd.f32 %v1671_v18, %v456_v0  ;;  %v458_v3 = vpop.f32.mrb[53].mxu0  ;;  %v725_v4 = vadd.f32 %v1674_v32, %v569_v2  ;;  %v571_v6 = vpop.f32.mrb[53].mxu1 }
 0x146   :  { %v724_v5 = vadd.f32 %v1677_v20, %v458_v3  ;;  %v460_v7 = vpop.f32.mrb[54].mxu0  ;;  %v726_v8 = vadd.f32 %v1680_v33, %v571_v6  ;;  %v573_v10 = vpop.f32.mrb[54].mxu1 }
 0x147   :  { %v731_v9 = vadd.f32 %v1671_v18, %v460_v7  ;;  %v462_v11 = vpop.f32.mrb[55].mxu0  ;;  %v733_v13 = vadd.f32 %v1674_v32, %v573_v10  ;;  %v575_v15 = vpop.f32.mrb[55].mxu1 }
 0x148   :  { %v1385_v12 = vpack.c.bf16 %v724_v5, %v723_v1  ;;  %v732_v14 = vadd.f32 %v1677_v20, %v462_v11  ;;  %v1386_v16 = vpack.c.bf16 %v726_v8, %v725_v4  ;;  %v734_v17 = vadd.f32 %v1680_v33, %v575_v15 }
 0x14a   :  { %1193 = vst [vmem:[#allocation2 + $0x150] sm:$0xff] %v1385_v12  ;;  %v1389_v19 = vpack.c.bf16 %v732_v14, %v731_v9  ;;  %1194 = vst [vmem:[#allocation2 + $0x158] sm:$0xff] %v1386_v16  ;;  %v1390_v26 = vpack.c.bf16 %v734_v17, %v733_v13 }
 0x14c   :  { %1197 = vst [vmem:[#allocation2 + $0x170] sm:$0xff] %v1389_v19  ;;  %v466_v34 = vpop.f32.mrb[56].mxu0  ;;  %1198 = vst [vmem:[#allocation2 + $0x178] sm:$0xff] %v1390_v26  ;;  %v579_v21 = vpop.f32.mrb[56].mxu1 }
 0x14d   :  { %v739_v35 = vadd.f32 %v1671_v18, %v466_v34  ;;  %v468_v22 = vpop.f32.mrb[57].mxu0  ;;  %v741_v23 = vadd.f32 %v1674_v32, %v579_v21  ;;  %v581_v25 = vpop.f32.mrb[57].mxu1 }
 0x14e   :  { %v740_v24 = vadd.f32 %v1677_v20, %v468_v22  ;;  %v470_v27 = vpop.f32.mrb[58].mxu0  ;;  %v742_v29 = vadd.f32 %v1680_v33, %v581_v25  ;;  %v583_v31 = vpop.f32.mrb[58].mxu1 }
 0x14f   :  { %v747_v30 = vadd.f32 %v1671_v18, %v470_v27  ;;  %v472_v28 = vpop.f32.mrb[59].mxu0  ;;  %v749_v37 = vadd.f32 %v1674_v32, %v583_v31  ;;  %v585_v39 = vpop.f32.mrb[59].mxu1 }
 0x150   :  { %v1393_v36 = vpack.c.bf16 %v740_v24, %v739_v35  ;;  %v748_v38 = vadd.f32 %v1677_v20, %v472_v28  ;;  %v1394_v40 = vpack.c.bf16 %v742_v29, %v741_v23  ;;  %v750_v41 = vadd.f32 %v1680_v33, %v585_v39 }
 0x152   :  { %1201 = vst [vmem:[#allocation2 + $0x190] sm:$0xff] %v1393_v36  ;;  %v1397_v42 = vpack.c.bf16 %v748_v38, %v747_v30  ;;  %1202 = vst [vmem:[#allocation2 + $0x198] sm:$0xff] %v1394_v40  ;;  %v1398_v43 = vpack.c.bf16 %v750_v41, %v749_v37 }
 0x154   :  { %1205 = vst [vmem:[#allocation2 + $0x1b0] sm:$0xff] %v1397_v42  ;;  %v476_v44 = vpop.f32.mrb[60].mxu0  ;;  %1206 = vst [vmem:[#allocation2 + $0x1b8] sm:$0xff] %v1398_v43  ;;  %v589_v46 = vpop.f32.mrb[60].mxu1 }
 0x155   :  { %v755_v45 = vadd.f32 %v1671_v18, %v476_v44  ;;  %v478_v47 = vpop.f32.mrb[61].mxu0  ;;  %v757_v48 = vadd.f32 %v1674_v32, %v589_v46  ;;  %v591_v50 = vpop.f32.mrb[61].mxu1 }
 0x156   :  { %v756_v49 = vadd.f32 %v1677_v20, %v478_v47  ;;  %v480_v51 = vpop.f32.mrb[62].mxu0  ;;  %v758_v52 = vadd.f32 %v1680_v33, %v591_v50  ;;  %v593_v54 = vpop.f32.mrb[62].mxu1 }
 0x157   :  { %v763_v53 = vadd.f32 %v1671_v18, %v480_v51  ;;  %v482_v55 = vpop.f32.mrb[63].mxu0  ;;  %v765_v57 = vadd.f32 %v1674_v32, %v593_v54  ;;  %v595_v59 = vpop.f32.mrb[63].mxu1 }
 0x158   :  { %v1401_v56 = vpack.c.bf16 %v756_v49, %v755_v45  ;;  %v764_v58 = vadd.f32 %v1677_v20, %v482_v55  ;;  %v1402_v60 = vpack.c.bf16 %v758_v52, %v757_v48  ;;  %v766_v61 = vadd.f32 %v1680_v33, %v595_v59 }
 0x15a   :  { %1209 = vst [vmem:[#allocation2 + $0x1d0] sm:$0xff] %v1401_v56  ;;  %v1405_v62 = vpack.c.bf16 %v764_v58, %v763_v53  ;;  %1210 = vst [vmem:[#allocation2 + $0x1d8] sm:$0xff] %v1402_v60  ;;  %v1406_v63 = vpack.c.bf16 %v766_v61, %v765_v57 }
 0x15c   :  { %1213 = vst [vmem:[#allocation2 + $0x1f0] sm:$0xff] %v1405_v62  ;;  %1214 = vst [vmem:[#allocation2 + $0x1f8] sm:$0xff] %v1406_v63 }
 0x15d   :  { %1430 = shalt.err (!%p1427_p4)
}
 0x15e   :  { %s1431_s21 = scalar_lea.hbm %s1761_s3, 8192 }
 0x15f   :  { %p1432_p5 = scmp.ne.s32.totalorder %s1761_s3, %s1431_s21  ;;  %p1435_p6 = scmp.lt.u32.totalorder %s1431_s21, %s1761_s3 }
 0x161   :  { %p1437_p7 = pnand %p1435_p6, %p1432_p5 }
 0x163   :  { %1440 = shalt.err (!%p1437_p7)
}
 0x164   :  { %s1445_s26 = smov 512   ;;  %s1446_s27 = smov 32  }
 0x165   :  { %1226 = dma.vmem_to_hbm [thread:$0]  %s1221_s17, 8192, %s1761_s3, [#allocation3], %s1445_s26, %s1445_s26, %s1446_s27  }
 0x166   :  { %1441 = dma.done.wait [#allocation3], 8192  }
 0x167   :  { %1442 = vsyncadd [#allocation3], 4294959104 }
 0x168   :  { %1230 = vsyncpa [#allocation3], 1 }

</bundles_post_ra>
